<compile_context>
chip_gen: v7x
topology: tpu7x:2x2x1
jax: 0.10.0
libtpu: 0.0.40
codegen_flags: <defaults>
</compile_context>

<pallas_src>
import functools

import jax
import jax.numpy as jnp
from jax import lax
from jax.experimental import pallas as pl
from jax.experimental.pallas import tpu as pltpu

# ---- synthesized "act_format" (layer_format[0]) -----------------------------
MANT_BITS = 4      # signed mantissa bits of the block-FP format
BLOCK_SIZE = 8     # elements per shared-exponent block (contiguous/innermost)

_EXP_OFF = MANT_BITS - 2                      # scale = 2^(e_max - _EXP_OFF)
_QMAX = float(2 ** (MANT_BITS - 1) - 1)       # +7

_SUBLANE = 8
_TARGET_TILE_BYTES = 4 * 1024 * 1024          # per-grid-step I/O tile
_STRIP_TARGET_BYTES = 64 * 1024               # f32 bytes per in-register strip
_PALLAS_MIN_ELEMS = 256 * 1024                # below this, use pure-JAX path
_MIN_GRID_STEPS = 8                           # pipelining / megacore balance
_VMEM_LIMIT_BYTES = 48 * 1024 * 1024


def _bfp_quant_ref(x):
    """Pure-JAX reference (and small-tensor fast path) of the BFP quant."""
    xf = x.astype(jnp.float32).reshape(-1, BLOCK_SIZE)
    maxabs = jnp.max(jnp.abs(xf), axis=-1, keepdims=True)
    ebits = jnp.maximum(lax.bitcast_convert_type(maxabs, jnp.int32) >> 23, 3)
    scale = lax.bitcast_convert_type((ebits - _EXP_OFF) << 23, jnp.float32)
    inv = lax.bitcast_convert_type((254 + _EXP_OFF - ebits) << 23, jnp.float32)
    # |xf * inv| < 8 by construction -> the lower clip (-8) is redundant.
    q = jnp.minimum(jnp.round(xf * inv), _QMAX) * scale
    return q.reshape(x.shape).astype(x.dtype)


def _bfp_quant_kernel(x_ref, o_ref, *, strip, n_strips, width):
    """Quantize one (tm, width) lane-dense tile, strip by strip.

    Each (strip, width) row strip (~8-16 f32 vregs per live value) goes through
    the full op chain inside a fori_loop so intermediates never spill to VMEM.
    Out-of-range rows of a partial last tile are computed on garbage but their
    HBM writeback is masked by Pallas — do not remove the loop over them.
    """
    # Loop-invariant block-start lane mask (hoisted: computed once per grid
    # step, reused by every strip — only the select remains per-strip).
    lane = lax.broadcasted_iota(jnp.int32, (strip, width), 1)
    is_start = (lane & (BLOCK_SIZE - 1)) == 0

    def body(i, carry):
        row = pl.multiple_of(i * strip, strip)
        x = x_ref[pl.ds(row, strip), :].astype(jnp.float32)  # no-op for f32 in

        # ---- per-block max|x| (8 consecutive lanes), lane-dense ------------
        a = jnp.abs(x)
        w = a
        # forward sliding max: w[i] = max(a[i .. i+7]); wraparound is harmless
        # because only block-start lanes (i % 8 == 0, never wrapping) are kept.
        for s in (1, 2, 4):
            w = jnp.maximum(w, pltpu.roll(w, width - s, axis=1))
        b = jnp.where(is_start, w, -jnp.inf)
        # spread each block-start value to the 7 lanes to its right
        for s in (1, 2, 4):
            b = jnp.maximum(b, pltpu.roll(b, s, axis=1))
        # b >= 0 everywhere: every lane now holds its block's max|x|.

        # ---- shared exponent via exact exponent-bit extraction -------------
        ebits = jnp.maximum(pltpu.bitcast(b, jnp.int32) >> 23, 3)
        scale = pltpu.bitcast((ebits - _EXP_OFF) << 23, jnp.float32)
        inv = pltpu.bitcast((254 + _EXP_OFF - ebits) << 23, jnp.float32)

        # ---- quantize: exact power-of-two inverse, round, upper clip -------
        # |x * inv| < 8 strictly (inv derives from the block max), so only the
        # upper clip (+7) is needed; round-to-nearest-even per jnp.round.
        mant = jnp.minimum(jnp.round(x * inv), _QMAX)
        o_ref[pl.ds(row, strip), :] = (mant * scale).astype(o_ref.dtype)
        return carry

    lax.fori_loop(0, n_strips, body, 0)


def _choose_width(total):
    """Widest lane-dense width (>=128, multiple of 128) dividing total."""
    for w in (2048, 1024, 512, 256, 128):
        if total % w == 0:
            return w
    return None


def hmq_act(x):
    """HMQAct.forward(x): BFP-quantize activations (NCHW or any >=1-D array)."""
    orig_shape = x.shape
    orig_dtype = x.dtype
    total = x.size
    assert total % BLOCK_SIZE == 0, \
        "element count must be a multiple of BLOCK_SIZE"

    # Small tensors: single-step grids can't pipeline and pay full launch +
    # DMA-setup cost; XLA's fused elementwise path wins here.
    if total < _PALLAS_MIN_ELEMS:
        return _bfp_quant_ref(x)

    itemsize = jnp.dtype(orig_dtype).itemsize

    flat = x.reshape(-1)
    width = _choose_width(total)
    if width is None:
        # Pad to a multiple of 1024 (8x128) so every store is a full-lane vst.
        # total % 8 == 0, so padding only appends whole zero blocks: real block
        # membership is preserved and the pad is sliced off afterwards.
        width = 1024
        padded_total = pl.cdiv(total, width) * width
        flat = jnp.pad(flat, (0, padded_total - total))
    else:
        padded_total = total
    x2 = flat.reshape(-1, width)
    r = x2.shape[0]

    # Strip rows: keep each live f32 value in the per-strip chain at ~8-16
    # vregs so the whole chain stays in registers (no spill ld/st traffic).
    strip = max(_SUBLANE,
                (_STRIP_TARGET_BYTES // (width * 4)) // _SUBLANE * _SUBLANE)

    # Tile rows from the real element size (bf16 gets full-size tiles too).
    tm = max(strip,
             (_TARGET_TILE_BYTES // (width * itemsize)) // strip * strip)
    # Prefer >= ~8 grid steps: pipelining + megacore (v7x, 2 TCs) balance.
    if pl.cdiv(r, tm) < _MIN_GRID_STEPS:
        tm = max(strip, (pl.cdiv(r, _MIN_GRID_STEPS) // strip) * strip)
    n_strips = tm // strip
    # Partial last row-tile: reads include garbage rows (computed on, harmless),
    # HBM writeback of those rows is masked by Pallas.
    grid = (pl.cdiv(r, tm),)

    kernel = functools.partial(_bfp_quant_kernel,
                               strip=strip, n_strips=n_strips, width=width)

    out = pl.pallas_call(
        kernel,
        out_shape=jax.ShapeDtypeStruct((r, width), orig_dtype),
        grid_spec=pltpu.PrefetchScalarGridSpec(
            num_scalar_prefetch=0,
            grid=grid,
            in_specs=[pl.BlockSpec((tm, width), lambda i: (i, 0))],
            out_specs=pl.BlockSpec((tm, width), lambda i: (i, 0)),
        ),
        compiler_params=pltpu.CompilerParams(
            dimension_semantics=("parallel",),
            vmem_limit_bytes=_VMEM_LIMIT_BYTES,
        ),
    )(x2)

    out_flat = out.reshape(-1)
    if padded_total != total:
        out_flat = out_flat[:total]
    return out_flat.reshape(orig_shape)


if __name__ == "__main__":
    key = jax.random.PRNGKey(0)
    k1, k2 = jax.random.split(key)

    # Small NCHW activation (batch=2, channels=4, spatial=16) -> fused JAX path.
    x_small = jax.random.normal(k1, (2, 4, 16, 16), dtype=jnp.float32) * 3.0
    y_small = jax.block_until_ready(hmq_act(x_small))
    assert y_small.shape == x_small.shape and y_small.dtype == x_small.dtype
    assert jnp.allclose(y_small, _bfp_quant_ref(x_small), atol=1e-6, rtol=1e-6)

    # Larger activation (still modest: ~1.6 MB) that exercises the Pallas path.
    x_big = jax.random.normal(k2, (8, 16, 56, 56), dtype=jnp.float32) * 3.0
    y_big = jax.block_until_ready(hmq_act(x_big))
    y_ref = _bfp_quant_ref(x_big)
    assert y_big.shape == x_big.shape and y_big.dtype == x_big.dtype
    assert jnp.allclose(y_big, y_ref, atol=1e-6, rtol=1e-6)

    print("KERNEL_OK")
</pallas_src>

<mosaic_0001>
module attributes {stable_mosaic.version = 11 : i64} {
  func.func @_bfp_quant_kernel(%arg0: i32, %arg1: memref<24x2048xf32, #tpu.memory_space<vmem>>, %arg2: memref<24x2048xf32, #tpu.memory_space<vmem>>) attributes {dimension_semantics = [#tpu.dimension_semantics<parallel>], iteration_bounds = array<i64: 9>, scalar_prefetch = 0 : i64, scratch_operands = 0 : i64, tpu.core_type = #tpu.core_type<tc>, window_params = [{transform_indices = @transform_0, window_bounds = array<i64: 24, 2048>}, {transform_indices = @transform_1, window_bounds = array<i64: 24, 2048>}]} {
    %0 = tpu.iota {dimensions = array<i32: 1>} : vector<8x2048xi32>
    %c7_i32 = arith.constant 7 : i32
    %1 = vector.broadcast %c7_i32 : i32 to vector<8x2048xi32>
    %2 = arith.andi %0, %1 : vector<8x2048xi32>
    %c0_i32 = arith.constant 0 : i32
    %3 = vector.broadcast %c0_i32 : i32 to vector<8x2048xi32>
    %4 = arith.cmpi eq, %2, %3 : vector<8x2048xi32>
    %c0_i32_0 = arith.constant 0 : i32
    %c3_i32 = arith.constant 3 : i32
    %5 = arith.addi %c0_i32_0, %c3_i32 : i32
    %c1_i32 = arith.constant 1 : i32
    scf.for %arg3 = %c0_i32_0 to %5 step %c1_i32  : i32 {
      %c8_i32 = arith.constant 8 : i32
      %6 = arith.muli %arg3, %c8_i32 : i32
      %7 = tpu.assume_multiple %6, 8 : i32
      %8 = arith.index_cast %7 : i32 to index
      %c0 = arith.constant 0 : index
      %9 = vector.load %arg1[%8, %c0] : memref<24x2048xf32, #tpu.memory_space<vmem>>, vector<8x2048xf32>
      %10 = math.absf %9 : vector<8x2048xf32>
      %c2047_i32 = arith.constant 2047 : i32
      %11 = tpu.dynamic_rotate %10 by %c2047_i32 dim 1 : vector<8x2048xf32>, i32 -> vector<8x2048xf32>
      %12 = arith.maximumf %10, %11 : vector<8x2048xf32>
      %c2046_i32 = arith.constant 2046 : i32
      %13 = tpu.dynamic_rotate %12 by %c2046_i32 dim 1 : vector<8x2048xf32>, i32 -> vector<8x2048xf32>
      %14 = arith.maximumf %12, %13 : vector<8x2048xf32>
      %c2044_i32 = arith.constant 2044 : i32
      %15 = tpu.dynamic_rotate %14 by %c2044_i32 dim 1 : vector<8x2048xf32>, i32 -> vector<8x2048xf32>
      %16 = arith.maximumf %14, %15 : vector<8x2048xf32>
      %cst = arith.constant 0xFF800000 : f32
      %17 = vector.broadcast %cst : f32 to vector<8x2048xf32>
      %18 = arith.select %4, %16, %17 : vector<8x2048xi1>, vector<8x2048xf32>
      %c1_i32_2 = arith.constant 1 : i32
      %19 = tpu.dynamic_rotate %18 by %c1_i32_2 dim 1 : vector<8x2048xf32>, i32 -> vector<8x2048xf32>
      %20 = arith.maximumf %18, %19 : vector<8x2048xf32>
      %c2_i32 = arith.constant 2 : i32
      %21 = tpu.dynamic_rotate %20 by %c2_i32 dim 1 : vector<8x2048xf32>, i32 -> vector<8x2048xf32>
      %22 = arith.maximumf %20, %21 : vector<8x2048xf32>
      %c4_i32 = arith.constant 4 : i32
      %23 = tpu.dynamic_rotate %22 by %c4_i32 dim 1 : vector<8x2048xf32>, i32 -> vector<8x2048xf32>
      %24 = arith.maximumf %22, %23 : vector<8x2048xf32>
      %25 = tpu.bitcast %24 : vector<8x2048xf32> -> vector<8x2048xi32>
      %c23_i32 = arith.constant 23 : i32
      %26 = vector.broadcast %c23_i32 : i32 to vector<8x2048xi32>
      %27 = arith.shrsi %25, %26 : vector<8x2048xi32>
      %c3_i32_3 = arith.constant 3 : i32
      %28 = vector.broadcast %c3_i32_3 : i32 to vector<8x2048xi32>
      %29 = arith.maxsi %27, %28 : vector<8x2048xi32>
      %c2_i32_4 = arith.constant 2 : i32
      %30 = vector.broadcast %c2_i32_4 : i32 to vector<8x2048xi32>
      %31 = arith.subi %29, %30 : vector<8x2048xi32>
      %c23_i32_5 = arith.constant 23 : i32
      %32 = vector.broadcast %c23_i32_5 : i32 to vector<8x2048xi32>
      %33 = arith.shli %31, %32 : vector<8x2048xi32>
      %34 = tpu.bitcast %33 : vector<8x2048xi32> -> vector<8x2048xf32>
      %c256_i32 = arith.constant 256 : i32
      %35 = vector.broadcast %c256_i32 : i32 to vector<8x2048xi32>
      %36 = arith.subi %35, %29 : vector<8x2048xi32>
      %c23_i32_6 = arith.constant 23 : i32
      %37 = vector.broadcast %c23_i32_6 : i32 to vector<8x2048xi32>
      %38 = arith.shli %36, %37 : vector<8x2048xi32>
      %39 = tpu.bitcast %38 : vector<8x2048xi32> -> vector<8x2048xf32>
      %40 = arith.mulf %9, %39 : vector<8x2048xf32>
      %41 = math.roundeven %40 : vector<8x2048xf32>
      %cst_7 = arith.constant 7.000000e+00 : f32
      %42 = vector.broadcast %cst_7 : f32 to vector<8x2048xf32>
      %43 = arith.minimumf %41, %42 : vector<8x2048xf32>
      %44 = arith.mulf %43, %34 : vector<8x2048xf32>
      %45 = arith.index_cast %7 : i32 to index
      %c0_8 = arith.constant 0 : index
      %46 = vector.load %arg2[%45, %c0_8] : memref<24x2048xf32, #tpu.memory_space<vmem>>, vector<8x2048xf32>
      tpu.vector_store %arg2[%45, %c0_8], %44 {strides = array<i32>} : memref<24x2048xf32, #tpu.memory_space<vmem>>, vector<8x2048xf32>,
    }
    %c3_i32_1 = arith.constant 3 : i32
    return
  }
  func.func @transform_0(%arg0: i32) -> (i32, i32) {
    %c0_i32 = arith.constant 0 : i32
    %c0_i32_0 = arith.constant 0 : i32
    return %arg0, %c0_i32 : i32, i32
  }
  func.func @transform_1(%arg0: i32) -> (i32, i32) {
    %c0_i32 = arith.constant 0 : i32
    %c0_i32_0 = arith.constant 0 : i32
    return %arg0, %c0_i32 : i32, i32
  }
}

</mosaic_0001>

<bundles_post_ra>
// kernel: tpu_custom_call.1
= control target key start
LH: loop header
LB: loop body
LE: loop exit
PB: predicated region body
PF: predicated region fallthrough
CT: control target
= control target key end

     0   :  { %6 = vsyncpa [#allocation3], 0  ;;  %s2237_s0 = inlined_call_operand.hbm [shape: f32[196,2048], index: 0, kind: input, shape index: {}]   ;;  %s2238_s1 = inlined_call_operand.hbm [shape: f32[196,2048], index: 1, kind: output, shape index: {}]  }
   0x1   :  { %8 = vsyncpa [#allocation3 + $0x1], 0 }
   0x2   :  { %9 = vsyncpa [#allocation4], 0 }
   0x3   :  { %11 = vsyncpa [#allocation4 + $0x1], 0  ;;  %s1258_s6 = smov 0   ;;  %s1260_s7 = smov 0  }
   0x4   :  { %s1262_s8 = smov 0   ;;  %s1264_s9 = smov 0  }
   0x5 LB: > { %s1279_s10 = sadd.s32 4294967295, %s1230_s9   ;;  %s1000_s11 = sadd.s32 4294967294, %s1230_s9   ;;  %s1230_s9 = sphi %s1264_s9, %s2285_s9   ;;  %s1226_s8 = sphi %s1262_s8, %s2284_s8   ;;  %s1222_s7 = sphi %s1260_s7, %s2283_s7   ;;  %s1218_s6 = sphi %s1258_s6, %s2282_s6  }
   0x6   : > { %s1283_s12 = sadd.s32 1, %s1230_s9   ;;  %s24_s13 = sadd.s32 1, %s1226_s8 }
   0x7   : > { %s21_s14 = ssub.s32 %s1230_s9, %s1283_s12  ;;  %p31_p0 = scmp.ne.s32.totalorder %s1226_s8, %s1222_s7 }
   0x8   : > { %p22_p1 = scmp.eq.s32.totalorder %s21_s14, 0  ;;  %p32_p2 = scmp.eq.s32.totalorder %s1230_s9, 0 }
   0x9   : > { %p37_p3 = scmp.ne.s32.totalorder %s1222_s7, %s1218_s6  ;;  %p38_p4 = scmp.eq.s32.totalorder %s1279_s10, 0 }
   0xa   : > { %s1295_s15 = scalar_select %p22_p1, %s1226_s8, %s24_s13  }
   0xb   : > { %p33_p5 = por %p32_p2, %p31_p0  ;;  %p1297_p6 = por %p38_p4, %p37_p3 }
   0xc   : > { %p61_p7 = scmp.eq.s32.totalorder %s1279_s10, 8  ;;  %p67_p8 = scmp.eq.s32.totalorder %s1000_s11, 8 }
   0xd   : > { %p1002_p11 = scmp.ge.s32.totalorder %s1230_s9, 9 }
   0xe   : > { %p1302_p9 = por %p61_p7, %p31_p0  ;;  %p1306_p10 = por %p67_p8, %p37_p3 }
   0xf   : > { %83 = sbr.rel (%p1002_p11) target bundleno = 57 (0x39), region = 16 }
  0x10   : > { %s2242_s18 = scalar_select %p1306_p10, 1, 0 }
  0x16   : > { %86 = sbr.rel (!%p33_p5) target bundleno = 57 (0x39), region = 20  ;;  %s87_s19 = sand.u32 (%p33_p5), 1, %s1226_s8  }
  0x17   : > { %s92_s20 = smul.u32 (%p33_p5), 3, %s1230_s9  ;;  %s1316_s25 = scalar_lea.sflag (%p33_p5), [#allocation3], %s87_s19 }
  0x18   : > { %s1050_s21 = smul.u32 (%p33_p5), 384, %s87_s19 }
  0x19   : > { %s93_s22 = ssub.s32 (%p33_p5), 25, %s92_s20 }
  0x1a   : > { %p94_p12 = scmp.lt.s32.totalorder (%p33_p5), %s93_s22, 3  ;;  %s91_s26 = scalar_lea.vmem (%p33_p5), [#allocation2], %s1050_s21 }
  0x1d   : > { %s2287_s22 = smov (!%p94_p12, %s93_s22), 3 }
  0x1e   : > { %s1313_s23 = sshll.u32 %s2287_s22, 11 }
  0x1f   : > { %s99_s24 = ssub.s32 6144, %s1313_s23 }
  0x20   : > { %100 = vsyncadd %s1316_s25, %s99_s24  ;;  %p1005_p13 = scmp.ne.s32.totalorder %s1313_s23, 0  ;;  %s1048_s27 = smul.u32 6144, %s1230_s9 }
  0x21   : > { %s106_s28 = sshll.u32 %s91_s26, 4  ;;  %s1136_s11 = scalar_lea.hbm %s2237_s0, 51200  ;;  %s1326_s28 = int_to_ptr.vmem [resolvable:$true] %s106_s28 }
  0x22   : > { %s1324_s2 = scalar_lea.hbm %s2237_s0, %s1048_s27 }
  0x23   : > { %s1132_s3 = scalar_lea.hbm %s1324_s2, %s1313_s23  ;;  %p1137_p3 = scmp.lt.u32.totalorder %s1324_s2, %s2237_s0 }
  0x24   : > { %p1133_p0 = scmp.ne.s32.totalorder %s1324_s2, %s1132_s3  ;;  %p1138_p4 = scmp.lt.u32.totalorder %s1136_s11, %s1132_s3 }
  0x25   : > { %p1140_p7 = scmp.lt.u32.totalorder %s1132_s3, %s1324_s2 }
  0x26   : > { %p1134_p1 = pnand %p1133_p0, %p1005_p13  ;;  %p1139_p5 = por %p1138_p4, %p1137_p3 }
  0x28   : > { %p1135_p2 = pneg %p1134_p1  ;;  %p1141_p8 = por %p1140_p7, %p1139_p5 }
  0x2a   : > { %p1142_p11 = pnand %p1141_p8, %p1135_p2 }
  0x2c   : > { %1145 = shalt.err (!%p1142_p11)
}
  0x2d   : > { %s1146_s19 = scalar_lea.vmem %s1326_s28, %s1313_s23  ;;  %s1236_s20 = smov [#allocation2]  }
  0x2e   : > { %p1147_p12 = scmp.ne.s32.totalorder %s1326_s28, %s1146_s19  ;;  %s1150_s21 = sshll.u32 %s1236_s20, 4  ;;  %s1151_s21 = int_to_ptr.vmem [resolvable:$false] %s1150_s21 }
  0x2f   : > { %s1152_s22 = scalar_lea.vmem %s1151_s21, 12288  ;;  %p1153_p10 = scmp.lt.s32.totalorder %s1326_s28, %s1151_s21 }
  0x30   : > { %p1148_p0 = pnand %p1147_p12, %p1005_p13  ;;  %p1154_p3 = scmp.lt.s32.totalorder %s1152_s22, %s1146_s19 }
  0x32   : > { %p1149_p1 = pneg %p1148_p0  ;;  %p1155_p4 = por %p1154_p3, %p1153_p10 }
  0x34   : > { %p1156_p5 = pnand %p1155_p4, %p1149_p1 }
  0x36   : > { %1159 = shalt.err (!%p1156_p5)
}
  0x37   : > { %s1237_s24 = smov 2048   ;;  %s1238_s26 = smov 128  }
  0x38   : > { %112 = dma.hbm_to_vmem [thread:$0]  (%p1005_p13), %s1324_s2, %s1313_s23, %s1326_s28, %s1316_s25, %s1237_s24, %s1237_s24, %s1238_s26  }
  0x39 PF: > { %p1010_p2 = scmp.ge.s32.totalorder %s1230_s9, 1  ;;  %p114_p7 = scmp.lt.s32.totalorder %s1230_s9, 10 }
  0x3b   : > { %p115_p8 = pnand %p1010_p2, %p114_p7 }
  0x3d   : > { %118 = sbr.rel (%p115_p8) target bundleno = 941 (0x3ad), region = 24 }
  0x44   : > { %s1356_s27 = sand.u32 1, %s1222_s7  }
  0x45   : > { %s1051_s29 = smul.u32 384, %s1356_s27  ;;  %s121_s30 = scalar_lea.sflag [#allocation3], %s1356_s27 }
  0x47   : > { %s1362_s3 = scalar_lea.vmem [#allocation2], %s1051_s29 }
  0x48   : > { %1209 = dma.done.wait (%p1297_p6), %s121_s30, 6144  }
  0x49   : > { %1211 = vsyncadd (%p1297_p6), %s121_s30, 4294961152  ;;  %v155_v0 = vlaneseq  ;;  %v2243_v33 = vmov 0  ;;  %v2246_v34 = vmov 0  ;;  %v2272_v47 = vmov 0  ;;  %s1452_s16 = scalar_lea.vmem [#allocation5], %s1051_s29  ;;  %s1454_s23 = smov 0  }
  0x4a   : > { %v2274_v48 = vmov 0 }
  0x4b   : > { %v1368_v1 = vand.u32 127, %v155_v0 }
  0x4d   : > { %v157_v2 = vadd.s32 128, %v1368_v1  ;;  %v158_v3 = vadd.s32 256, %v1368_v1  ;;  %v159_v4 = vadd.s32 384, %v1368_v1  ;;  %v160_v5 = vadd.s32 512, %v1368_v1 }
  0x4e   : > { %v161_v6 = vadd.s32 640, %v1368_v1  ;;  %v162_v7 = vadd.s32 768, %v1368_v1  ;;  %v163_v8 = vadd.s32 896, %v1368_v1  ;;  %v164_v9 = vadd.s32 1024, %v1368_v1 }
  0x4f   : > { %v165_v10 = vadd.s32 1152, %v1368_v1  ;;  %v166_v11 = vadd.s32 1280, %v1368_v1  ;;  %v167_v12 = vadd.s32 1408, %v1368_v1  ;;  %v168_v13 = vadd.s32 1536, %v1368_v1 }
  0x50   : > { %v169_v14 = vadd.s32 1664, %v1368_v1  ;;  %v170_v15 = vadd.s32 1792, %v1368_v1  ;;  %v171_v16 = vadd.s32 1920, %v1368_v1  ;;  %v172_v17 = vand.u32 7, %v1368_v1 }
  0x51   : > { %v173_v18 = vand.u32 7, %v157_v2  ;;  %v174_v19 = vand.u32 7, %v158_v3  ;;  %v175_v20 = vand.u32 7, %v159_v4  ;;  %v176_v21 = vand.u32 7, %v160_v5 }
  0x52   : > { %v177_v22 = vand.u32 7, %v161_v6  ;;  %v178_v23 = vand.u32 7, %v162_v7  ;;  %v179_v24 = vand.u32 7, %v163_v8  ;;  %v180_v25 = vand.u32 7, %v164_v9 }
  0x53   : > { %v181_v26 = vand.u32 7, %v165_v10  ;;  %v182_v27 = vand.u32 7, %v166_v11  ;;  %v183_v28 = vand.u32 7, %v167_v12  ;;  %v184_v29 = vand.u32 7, %v168_v13 }
  0x54   : > { %v185_v30 = vand.u32 7, %v169_v14  ;;  %v186_v31 = vand.u32 7, %v170_v15  ;;  %v187_v32 = vand.u32 7, %v171_v16  ;;  %vm1386_vm0 = vcmp.eq.s32.totalorder %v172_v17, 0 }
  0x55   : > { %v2244_v33 = vsel %vm1386_vm0, 4294967295, %v2243_v33  ;;  %vm1390_vm1 = vcmp.eq.s32.totalorder %v173_v18, 0  ;;  %vm1394_vm2 = vcmp.eq.s32.totalorder %v174_v19, 0  ;;  %vm1398_vm3 = vcmp.eq.s32.totalorder %v175_v20, 0 }
  0x56   : > { %2245 = vst [vmem:[#allocation8_spill] sm:$0xff] %v2244_v33  ;;  %v2247_v34 = vsel %vm1390_vm1, 4294967295, %v2246_v34  ;;  %vm1402_vm4 = vcmp.eq.s32.totalorder %v176_v21, 0  ;;  %vm1406_vm5 = vcmp.eq.s32.totalorder %v177_v22, 0  ;;  %vm1410_vm6 = vcmp.eq.s32.totalorder %v178_v23, 0 }
  0x57   : > { %vm1414_vm7 = vcmp.eq.s32.totalorder %v179_v24, 0  ;;  %vm1418_vm8 = vcmp.eq.s32.totalorder %v180_v25, 0  ;;  %vm1422_vm9 = vcmp.eq.s32.totalorder %v181_v26, 0  ;;  %vm1426_vm10 = vcmp.eq.s32.totalorder %v182_v27, 0 }
  0x58   : > { %vm1430_vm11 = vcmp.eq.s32.totalorder %v183_v28, 0  ;;  %vm1434_vm12 = vcmp.eq.s32.totalorder %v184_v29, 0  ;;  %vm1438_vm13 = vcmp.eq.s32.totalorder %v185_v30, 0  ;;  %vm1442_vm14 = vcmp.eq.s32.totalorder %v186_v31, 0 }
  0x59   : > { %v2273_v47 = vsel %vm1442_vm14, 4294967295, %v2272_v47  ;;  %vm1446_vm15 = vcmp.eq.s32.totalorder %v187_v32, 0 }
  0x5a   : > { %v2275_v48 = vsel %vm1446_vm15, 4294967295, %v2274_v48 }
  0x5b LB: >> { %s1011_s25 = sshll.u32 %s1234_s23, 3  ;;  %s1239_s5 = smov 127   ;;  %vm280_vm14 = vcmp.lt.s32.totalorder %v1368_v1, 127  ;;  %vm410_vm15 = vcmp.lt.s32.totalorder %v1368_v1, 124  ;;  %vm2278_vm1 = vnez %v2247_v34  ;;  %s1234_s23 = sphi %s1454_s23, %s209_s23  }
  0x5c   : >> { %s1460_s28 = sshra.s32 %s1011_s25, 3  ;;  %s1240_s11 = smov 126  }
  0x5d   : >> { %s1043_s2 = sshll.u32 %s1460_s28, 7  ;;  %s1241_s13 = smov 124   ;;  %v2276_v33 = vld [vmem:[#allocation8_spill] sm:$0xff] }
  0x5e   : >> { %s1466_s4 = scalar_lea.vmem %s1362_s3, %s1043_s2 [#allocation2]  ;;  %vm2277_vm0 = vnez %v2276_v33  ;;  %s1242_s14 = smov 1  }
  0x5f   : >> { %v1469_v49 = vld [vmem:[%s1466_s4 + $0x10] sm:$0xff]  ;;  %v216_v50 = vld [vmem:[%s1466_s4] sm:$0xff]  ;;  %v1473_v51 = vld [vmem:[%s1466_s4 + $0x18] sm:$0xff]  ;;  %s1243_s19 = smov 2   ;;  %s1244_s20 = smov 4  }
  0x60   : >> { %v234_v52 = vand.u32 2147483647, %v1469_v49  ;;  %v232_v53 = vand.u32 2147483647, %v216_v50  ;;  %v1477_v54 = vld [vmem:[%s1466_s4 + $0x8] sm:$0xff]  ;;  %v1489_v58 = vld [vmem:[%s1466_s4 + $0x20] sm:$0xff]  ;;  %s2106_s21 = scalar_lea.vmem %s1452_s16, %s1043_s2 [#allocation5] }
  0x61   : >> { %v235_v55 = vand.u32 2147483647, %v1473_v51  ;;  %v233_v56 = vand.u32 2147483647, %v1477_v54  ;;  %v1486_v57 = vld [vmem:[%s1466_s4 + $0x28] sm:$0xff]  ;;  %v1496_v61 = vld [vmem:[%s1466_s4 + $0x38] sm:$0xff] }
  0x62   : >> { %252 = vrot.lane.b32.xlu1 %v234_v52, %s1239_s5  ;;  %248 = vrot.lane.b32.xlu0 %v232_v53, %s1239_s5  ;;  %v237_v59 = vand.u32 2147483647, %v1486_v57  ;;  %v236_v60 = vand.u32 2147483647, %v1489_v58  ;;  %v1499_v62 = vld [vmem:[%s1466_s4 + $0x30] sm:$0xff]  ;;  %v1506_v2 = vld [vmem:[%s1466_s4 + $0x48] sm:$0xff] }
  0x63   : >> { %v239_v63 = vand.u32 2147483647, %v1496_v61  ;;  %v238_v0 = vand.u32 2147483647, %v1499_v62  ;;  %v1509_v3 = vld [vmem:[%s1466_s4 + $0x40] sm:$0xff]  ;;  %v1516_v6 = vld [vmem:[%s1466_s4 + $0x58] sm:$0xff] }
  0x64   : >> { %v241_v4 = vand.u32 2147483647, %v1506_v2  ;;  %v240_v5 = vand.u32 2147483647, %v1509_v3  ;;  %v1519_v7 = vld [vmem:[%s1466_s4 + $0x50] sm:$0xff]  ;;  %v1528_v10 = vld [vmem:[%s1466_s4 + $0x68] sm:$0xff] }
  0x65   : >> { %v243_v8 = vand.u32 2147483647, %v1516_v6  ;;  %v242_v9 = vand.u32 2147483647, %v1519_v7  ;;  %v1531_v11 = vld [vmem:[%s1466_s4 + $0x60] sm:$0xff]  ;;  %v1542_v14 = vld [vmem:[%s1466_s4 + $0x78] sm:$0xff] }
  0x66   : >> { %254 = vrot.lane.b32.xlu1 %v235_v55, %s1239_s5  ;;  %250 = vrot.lane.b32.xlu0 %v233_v56, %s1239_s5  ;;  %v245_v12 = vand.u32 2147483647, %v1528_v10  ;;  %v244_v13 = vand.u32 2147483647, %v1531_v11  ;;  %v1545_v15 = vld [vmem:[%s1466_s4 + $0x70] sm:$0xff]  ;;  %s209_s23 = sadd.s32 1, %s1234_s23  }
  0x67   : >> { %v247_v16 = vand.u32 2147483647, %v1542_v14  ;;  %v246_v17 = vand.u32 2147483647, %v1545_v15  ;;  %p206_p6 = scmp.ge.s32.totalorder %s209_s23, 3  }
  0x68   : > { %s897_s22 = scalar_lea.sflag (%p206_p6), [#allocation4], %s1356_s27 }
  0x6a   : >> { %258 = vrot.lane.b32.xlu1 %v237_v59, %s1239_s5  ;;  %256 = vrot.lane.b32.xlu0 %v236_v60, %s1239_s5 }
  0x6e   : >> { %262 = vrot.lane.b32.xlu1 %v239_v63, %s1239_s5  ;;  %260 = vrot.lane.b32.xlu0 %v238_v0, %s1239_s5 }
  0x72   : >> { %266 = vrot.lane.b32.xlu1 %v241_v4, %s1239_s5  ;;  %264 = vrot.lane.b32.xlu0 %v240_v5, %s1239_s5 }
  0x76   : >> { %270 = vrot.lane.b32.xlu1 %v243_v8, %s1239_s5  ;;  %268 = vrot.lane.b32.xlu0 %v242_v9, %s1239_s5 }
  0x7a   : >> { %274 = vrot.lane.b32.xlu1 %v245_v12, %s1239_s5  ;;  %272 = vrot.lane.b32.xlu0 %v244_v13, %s1239_s5 }
  0x7e   : >> { %278 = vrot.lane.b32.xlu1 %v247_v16, %s1239_s5  ;;  %276 = vrot.lane.b32.xlu0 %v246_v17, %s1239_s5 }
  0xd4   : >> { %v253_v18 = vpop.permute.xlu1 %252  ;;  %v249_v19 = vpop.permute.xlu0 %248 }
  0xd8   : >> { %v255_v20 = vpop.permute.xlu1 %254  ;;  %v251_v21 = vpop.permute.xlu0 %250 }
  0xd9   : >> { %v294_v22 = vsel %vm280_vm14, %v251_v21, %v253_v18  ;;  %v295_v23 = vsel %vm280_vm14, %v249_v19, %v251_v21  ;;  %v293_v26 = vsel %vm280_vm14, %v253_v18, %v255_v20 }
  0xda   : >> { %v1566_v24 = vmax.f32 %v232_v53, %v295_v23  ;;  %v1568_v25 = vmax.f32 %v233_v56, %v294_v22  ;;  %v299_v30 = vmax.f32 %v234_v52, %v293_v26 }
  0xdc   : >> { %v259_v27 = vpop.permute.xlu1 %258  ;;  %313 = vrot.lane.b32.xlu0 %v1566_v24, %s1240_s11  ;;  %315 = vrot.lane.b32.xlu1 %v1568_v25, %s1240_s11  ;;  %v257_v28 = vpop.permute.xlu0 %256 }
  0xdd   : >> { %v292_v29 = vsel %vm280_vm14, %v255_v20, %v257_v28  ;;  %v291_v32 = vsel %vm280_vm14, %v257_v28, %v259_v27 }
  0xde   : >> { %v1580_v31 = vmax.f32 %v235_v55, %v292_v29  ;;  %v301_v18 = vmax.f32 %v236_v60, %v291_v32 }
  0xe0   : >> { %v263_v50 = vpop.permute.xlu1 %262  ;;  %317 = vrot.lane.b32.xlu0 %v299_v30, %s1240_s11  ;;  %319 = vrot.lane.b32.xlu1 %v1580_v31, %s1240_s11  ;;  %v261_v53 = vpop.permute.xlu0 %260 }
  0xe1   : >> { %v290_v56 = vsel %vm280_vm14, %v259_v27, %v261_v53  ;;  %v289_v52 = vsel %vm280_vm14, %v261_v53, %v263_v50 }
  0xe2   : >> { %v1589_v20 = vmax.f32 %v237_v59, %v290_v56  ;;  %v303_v23 = vmax.f32 %v238_v0, %v289_v52 }
  0xe4   : >> { %v267_v55 = vpop.permute.xlu1 %266  ;;  %321 = vrot.lane.b32.xlu0 %v301_v18, %s1240_s11  ;;  %323 = vrot.lane.b32.xlu1 %v1589_v20, %s1240_s11  ;;  %v265_v21 = vpop.permute.xlu0 %264 }
  0xe5   : >> { %v288_v22 = vsel %vm280_vm14, %v263_v50, %v265_v21  ;;  %v287_v59 = vsel %vm280_vm14, %v265_v21, %v267_v55 }
  0xe6   : >> { %v1598_v26 = vmax.f32 %v239_v63, %v288_v22  ;;  %v305_v29 = vmax.f32 %v240_v5, %v287_v59 }
  0xe8   : >> { %v271_v60 = vpop.permute.xlu1 %270  ;;  %325 = vrot.lane.b32.xlu0 %v303_v23, %s1240_s11  ;;  %327 = vrot.lane.b32.xlu1 %v1598_v26, %s1240_s11  ;;  %v269_v27 = vpop.permute.xlu0 %268 }
  0xe9   : >> { %v286_v28 = vsel %vm280_vm14, %v267_v55, %v269_v27  ;;  %v285_v63 = vsel %vm280_vm14, %v269_v27, %v271_v60 }
  0xea   : >> { %v1609_v32 = vmax.f32 %v241_v4, %v286_v28  ;;  %v307_v5 = vmax.f32 %v242_v9, %v285_v63 }
  0xec   : >> { %v275_v0 = vpop.permute.xlu1 %274  ;;  %329 = vrot.lane.b32.xlu0 %v305_v29, %s1240_s11  ;;  %331 = vrot.lane.b32.xlu1 %v1609_v32, %s1240_s11  ;;  %v273_v50 = vpop.permute.xlu0 %272 }
  0xed   : >> { %v284_v53 = vsel %vm280_vm14, %v271_v60, %v273_v50  ;;  %v283_v56 = vsel %vm280_vm14, %v273_v50, %v275_v0 }
  0xee   : >> { %v1622_v4 = vmax.f32 %v243_v8, %v284_v53  ;;  %v309_v7 = vmax.f32 %v244_v13, %v283_v56 }
  0xf0   : >> { %v279_v52 = vpop.permute.xlu1 %278  ;;  %333 = vrot.lane.b32.xlu0 %v307_v5, %s1240_s11  ;;  %335 = vrot.lane.b32.xlu1 %v1622_v4, %s1240_s11  ;;  %v277_v55 = vpop.permute.xlu0 %276 }
  0xf1   : >> { %v282_v21 = vsel %vm280_vm14, %v275_v0, %v277_v55  ;;  %v296_v8 = vsel %vm280_vm14, %v279_v52, %v249_v19  ;;  %v281_v9 = vsel %vm280_vm14, %v277_v55, %v279_v52  ;;  %vm345_vm14 = vcmp.lt.s32.totalorder %v1368_v1, 126 }
  0xf2   : >> { %v1635_v6 = vmax.f32 %v245_v12, %v282_v21  ;;  %v1646_v22 = vmax.f32 %v247_v16, %v296_v8  ;;  %v1650_v10 = vmax.f32 %v246_v17, %v281_v9 }
  0xf4   : >> { %337 = vrot.lane.b32.xlu0 %v309_v7, %s1240_s11  ;;  %339 = vrot.lane.b32.xlu1 %v1635_v6, %s1240_s11 }
  0xf8   : >> { %343 = vrot.lane.b32.xlu1 %v1646_v22, %s1240_s11  ;;  %341 = vrot.lane.b32.xlu0 %v1650_v10, %s1240_s11 }
 0x14e   : >> { %v316_v11 = vpop.permute.xlu1 %315  ;;  %v314_v12 = vpop.permute.xlu0 %313 }
 0x14f   : >> { %v360_v13 = vsel %vm345_vm14, %v314_v12, %v316_v11 }
 0x150   : >> { %v1660_v14 = vmax.f32 %v1566_v24, %v360_v13 }
 0x152   : >> { %v320_v16 = vpop.permute.xlu1 %319  ;;  %378 = vrot.lane.b32.xlu0 %v1660_v14, %s1241_s13  ;;  %v318_v15 = vpop.permute.xlu0 %317 }
 0x153   : >> { %v358_v17 = vsel %vm345_vm14, %v318_v15, %v320_v16  ;;  %v359_v19 = vsel %vm345_vm14, %v316_v11, %v318_v15 }
 0x154   : >> { %v1669_v59 = vmax.f32 %v1568_v25, %v359_v19  ;;  %v1671_v60 = vmax.f32 %v299_v30, %v358_v17 }
 0x156   : >> { %v324_v27 = vpop.permute.xlu1 %323  ;;  %380 = vrot.lane.b32.xlu1 %v1669_v59, %s1241_s13  ;;  %382 = vrot.lane.b32.xlu0 %v1671_v60, %s1241_s13  ;;  %v322_v24 = vpop.permute.xlu0 %321 }
 0x157   : >> { %v356_v28 = vsel %vm345_vm14, %v322_v24, %v324_v27  ;;  %v357_v63 = vsel %vm345_vm14, %v320_v16, %v322_v24 }
 0x158   : >> { %v1682_v0 = vmax.f32 %v1580_v31, %v357_v63  ;;  %v1684_v25 = vmax.f32 %v301_v18, %v356_v28 }
 0x15a   : >> { %v328_v30 = vpop.permute.xlu1 %327  ;;  %384 = vrot.lane.b32.xlu1 %v1682_v0, %s1241_s13  ;;  %386 = vrot.lane.b32.xlu0 %v1684_v25, %s1241_s13  ;;  %v326_v50 = vpop.permute.xlu0 %325 }
 0x15b   : >> { %v354_v53 = vsel %vm345_vm14, %v326_v50, %v328_v30  ;;  %v355_v56 = vsel %vm345_vm14, %v324_v27, %v326_v50 }
 0x15c   : >> { %v1695_v52 = vmax.f32 %v1589_v20, %v355_v56  ;;  %v1697_v31 = vmax.f32 %v303_v23, %v354_v53 }
 0x15e   : >> { %v332_v18 = vpop.permute.xlu1 %331  ;;  %388 = vrot.lane.b32.xlu1 %v1695_v52, %s1241_s13  ;;  %390 = vrot.lane.b32.xlu0 %v1697_v31, %s1241_s13  ;;  %v330_v55 = vpop.permute.xlu0 %329 }
 0x15f   : >> { %v352_v21 = vsel %vm345_vm14, %v330_v55, %v332_v18  ;;  %v353_v8 = vsel %vm345_vm14, %v328_v30, %v330_v55 }
 0x160   : >> { %v1708_v9 = vmax.f32 %v1598_v26, %v353_v8  ;;  %v1710_v20 = vmax.f32 %v305_v29, %v352_v21 }
 0x162   : >> { %v336_v23 = vpop.permute.xlu1 %335  ;;  %392 = vrot.lane.b32.xlu1 %v1708_v9, %s1241_s13  ;;  %394 = vrot.lane.b32.xlu0 %v1710_v20, %s1241_s13  ;;  %v334_v11 = vpop.permute.xlu0 %333 }
 0x163   : >> { %v350_v13 = vsel %vm345_vm14, %v334_v11, %v336_v23  ;;  %v351_v16 = vsel %vm345_vm14, %v332_v18, %v334_v11 }
 0x164   : >> { %v1721_v15 = vmax.f32 %v1609_v32, %v351_v16  ;;  %v1723_v26 = vmax.f32 %v307_v5, %v350_v13 }
 0x166   : >> { %v340_v29 = vpop.permute.xlu1 %339  ;;  %396 = vrot.lane.b32.xlu1 %v1721_v15, %s1241_s13  ;;  %398 = vrot.lane.b32.xlu0 %v1723_v26, %s1241_s13  ;;  %v338_v17 = vpop.permute.xlu0 %337 }
 0x167   : >> { %v348_v19 = vsel %vm345_vm14, %v338_v17, %v340_v29  ;;  %v349_v27 = vsel %vm345_vm14, %v336_v23, %v338_v17 }
 0x168   : >> { %v1734_v24 = vmax.f32 %v1622_v4, %v349_v27  ;;  %v1736_v32 = vmax.f32 %v309_v7, %v348_v19 }
 0x16a   : >> { %v344_v5 = vpop.permute.xlu1 %343  ;;  %400 = vrot.lane.b32.xlu1 %v1734_v24, %s1241_s13  ;;  %402 = vrot.lane.b32.xlu0 %v1736_v32, %s1241_s13  ;;  %v342_v28 = vpop.permute.xlu0 %341 }
 0x16b   : >> { %v346_v63 = vsel %vm345_vm14, %v342_v28, %v344_v5  ;;  %v347_v30 = vsel %vm345_vm14, %v340_v29, %v342_v28  ;;  %v361_v7 = vsel %vm345_vm14, %v344_v5, %v314_v12  ;;  %vm2279_vm14 = vnez %v2275_v48 }
 0x16c   : >> { %v1747_v50 = vmax.f32 %v1635_v6, %v347_v30  ;;  %v1750_v4 = vmax.f32 %v1650_v10, %v346_v63  ;;  %v1759_v53 = vmax.f32 %v1646_v22, %v361_v7 }
 0x16e   : >> { %404 = vrot.lane.b32.xlu1 %v1747_v50, %s1241_s13  ;;  %406 = vrot.lane.b32.xlu0 %v1750_v4, %s1241_s13 }
 0x172   : >> { %408 = vrot.lane.b32.xlu1 %v1759_v53, %s1241_s13 }
 0x1c4   : >> { %v1763_v6 = vpop.permute.xlu0 %378 }
 0x1c8   : >> { %v381_v10 = vpop.permute.xlu1 %380  ;;  %v383_v56 = vpop.permute.xlu0 %382 }
 0x1c9   : >> { %v425_v12 = vsel %vm410_vm15, %v1763_v6, %v381_v10  ;;  %v424_v18 = vsel %vm410_vm15, %v381_v10, %v383_v56 }
 0x1ca   : >> { %v427_v55 = vmax.f32 %v1660_v14, %v425_v12  ;;  %v428_v22 = vmax.f32 %v1669_v59, %v424_v18 }
 0x1cc   : >> { %v385_v21 = vpop.permute.xlu1 %384  ;;  %v387_v8 = vpop.permute.xlu0 %386  ;;  %v1775_v23 = vsel %vm2277_vm0, %v427_v55, -inf  ;;  %v1779_v11 = vsel %vm2278_vm1, %v428_v22, -inf  ;;  %vm2280_vm0 = vnez %v2273_v47 }
 0x1cd   : >> { %v423_v13 = vsel %vm410_vm15, %v383_v56, %v385_v21  ;;  %v422_v16 = vsel %vm410_vm15, %v385_v21, %v387_v8  ;;  %459 = vrot.lane.b32.xlu0 %v1775_v23, %s1242_s14  ;;  %461 = vrot.lane.b32.xlu1 %v1779_v11, %s1242_s14 }
 0x1ce   : >> { %v429_v14 = vmax.f32 %v1671_v60, %v423_v13  ;;  %v430_v59 = vmax.f32 %v1682_v0, %v422_v16 }
 0x1d0   : >> { %v389_v29 = vpop.permute.xlu1 %388  ;;  %v391_v17 = vpop.permute.xlu0 %390  ;;  %v1793_v19 = vsel %vm1394_vm2, %v429_v14, -inf  ;;  %v1797_v27 = vsel %vm1398_vm3, %v430_v59, -inf }
 0x1d1   : >> { %v421_v5 = vsel %vm410_vm15, %v387_v8, %v389_v29  ;;  %v420_v28 = vsel %vm410_vm15, %v389_v29, %v391_v17  ;;  %463 = vrot.lane.b32.xlu0 %v1793_v19, %s1242_s14  ;;  %465 = vrot.lane.b32.xlu1 %v1797_v27, %s1242_s14 }
 0x1d2   : >> { %v431_v60 = vmax.f32 %v1684_v25, %v421_v5  ;;  %v432_v0 = vmax.f32 %v1695_v52, %v420_v28 }
 0x1d4   : >> { %v393_v63 = vpop.permute.xlu1 %392  ;;  %v395_v30 = vpop.permute.xlu0 %394  ;;  %v1811_v7 = vsel %vm1402_vm4, %v431_v60, -inf  ;;  %v1815_v10 = vsel %vm1406_vm5, %v432_v0, -inf }
 0x1d5   : >> { %v419_v56 = vsel %vm410_vm15, %v391_v17, %v393_v63  ;;  %v418_v12 = vsel %vm410_vm15, %v393_v63, %v395_v30  ;;  %467 = vrot.lane.b32.xlu0 %v1811_v7, %s1242_s14  ;;  %469 = vrot.lane.b32.xlu1 %v1815_v10, %s1242_s14 }
 0x1d6   : >> { %v433_v25 = vmax.f32 %v1697_v31, %v419_v56  ;;  %v434_v52 = vmax.f32 %v1708_v9, %v418_v12 }
 0x1d8   : >> { %v397_v18 = vpop.permute.xlu1 %396  ;;  %v399_v55 = vpop.permute.xlu0 %398  ;;  %v1829_v22 = vsel %vm1410_vm6, %v433_v25, -inf  ;;  %v450_v21 = vsel %vm1414_vm7, %v434_v52, -inf }
 0x1d9   : >> { %v417_v8 = vsel %vm410_vm15, %v395_v30, %v397_v18  ;;  %v416_v13 = vsel %vm410_vm15, %v397_v18, %v399_v55  ;;  %471 = vrot.lane.b32.xlu0 %v1829_v22, %s1242_s14  ;;  %473 = vrot.lane.b32.xlu1 %v450_v21, %s1242_s14 }
 0x1da   : >> { %v435_v31 = vmax.f32 %v1710_v20, %v417_v8  ;;  %v436_v9 = vmax.f32 %v1721_v15, %v416_v13 }
 0x1dc   : >> { %v401_v16 = vpop.permute.xlu1 %400  ;;  %v403_v14 = vpop.permute.xlu0 %402  ;;  %v1844_v59 = vsel %vm1418_vm8, %v435_v31, -inf  ;;  %v452_v29 = vsel %vm1422_vm9, %v436_v9, -inf }
 0x1dd   : >> { %v415_v17 = vsel %vm410_vm15, %v399_v55, %v401_v16  ;;  %v414_v5 = vsel %vm410_vm15, %v401_v16, %v403_v14  ;;  %475 = vrot.lane.b32.xlu0 %v1844_v59, %s1242_s14  ;;  %477 = vrot.lane.b32.xlu1 %v452_v29, %s1242_s14 }
 0x1de   : >> { %v437_v20 = vmax.f32 %v1723_v26, %v415_v17  ;;  %v438_v15 = vmax.f32 %v1734_v24, %v414_v5 }
 0x1e0   : >> { %v405_v28 = vpop.permute.xlu1 %404  ;;  %v407_v60 = vpop.permute.xlu0 %406  ;;  %v1859_v0 = vsel %vm1426_vm10, %v437_v20, -inf  ;;  %v454_v63 = vsel %vm1430_vm11, %v438_v15, -inf }
 0x1e1   : >> { %v413_v30 = vsel %vm410_vm15, %v403_v14, %v405_v28  ;;  %v412_v56 = vsel %vm410_vm15, %v405_v28, %v407_v60  ;;  %479 = vrot.lane.b32.xlu0 %v1859_v0, %s1242_s14  ;;  %481 = vrot.lane.b32.xlu1 %v454_v63, %s1242_s14 }
 0x1e2   : >> { %v439_v26 = vmax.f32 %v1736_v32, %v413_v30  ;;  %v440_v24 = vmax.f32 %v1747_v50, %v412_v56 }
 0x1e4   : >> { %v409_v12 = vpop.permute.xlu1 %408  ;;  %v1874_v25 = vsel %vm1434_vm12, %v439_v26, -inf  ;;  %v456_v52 = vsel %vm1438_vm13, %v440_v24, -inf }
 0x1e5   : >> { %v411_v18 = vsel %vm410_vm15, %v407_v60, %v409_v12  ;;  %v426_v55 = vsel %vm410_vm15, %v409_v12, %v1763_v6  ;;  %483 = vrot.lane.b32.xlu0 %v1874_v25, %s1242_s14  ;;  %485 = vrot.lane.b32.xlu1 %v456_v52, %s1242_s14  ;;  %vm491_vm15 = vcmp.lt.s32.totalorder %v1368_v1, 1 }
 0x1e6   : >> { %v442_v32 = vmax.f32 %v1759_v53, %v426_v55  ;;  %v441_v50 = vmax.f32 %v1750_v4, %v411_v18 }
 0x1e8   : >> { %v458_v8 = vsel %vm2279_vm14, %v442_v32, -inf  ;;  %v1892_v13 = vsel %vm2280_vm0, %v441_v50, -inf  ;;  %vm556_vm0 = vcmp.lt.s32.totalorder %v1368_v1, 2  ;;  %vm621_vm14 = vcmp.lt.s32.totalorder %v1368_v1, 4 }
 0x1e9   : >> { %489 = vrot.lane.b32.xlu1 %v458_v8, %s1242_s14  ;;  %487 = vrot.lane.b32.xlu0 %v1892_v13, %s1242_s14 }
 0x23f   : >> { %v462_v6 = vpop.permute.xlu1 %461  ;;  %v460_v31 = vpop.permute.xlu0 %459 }
 0x240   : >> { %v506_v53 = vsel %vm491_vm15, %v460_v31, %v462_v6 }
 0x241   : >> { %v1901_v4 = vmax.f32 %v1779_v11, %v506_v53 }
 0x243   : >> { %v466_v9 = vpop.permute.xlu1 %465  ;;  %526 = vrot.lane.b32.xlu1 %v1901_v4, %s1243_s19  ;;  %v464_v16 = vpop.permute.xlu0 %463 }
 0x244   : >> { %v504_v14 = vsel %vm491_vm15, %v464_v16, %v466_v9  ;;  %v505_v33 = vsel %vm491_vm15, %v462_v6, %v464_v16 }
 0x245   : >> { %v1908_v17 = vmax.f32 %v1797_v27, %v504_v14 }
 0x247   : >> { %v470_v5 = vpop.permute.xlu1 %469  ;;  %530 = vrot.lane.b32.xlu1 %v1908_v17, %s1243_s19  ;;  %v468_v20 = vpop.permute.xlu0 %467 }
 0x248   : >> { %v502_v11 = vsel %vm491_vm15, %v468_v20, %v470_v5 }
 0x249   : >> { %v1915_v15 = vmax.f32 %v1815_v10, %v502_v11 }
 0x24b   : >> { %v474_v28 = vpop.permute.xlu1 %473  ;;  %534 = vrot.lane.b32.xlu1 %v1915_v15, %s1243_s19  ;;  %v472_v60 = vpop.permute.xlu0 %471 }
 0x24c   : >> { %v500_v27 = vsel %vm491_vm15, %v472_v60, %v474_v28 }
 0x24d   : >> { %v1921_v30 = vmax.f32 %v450_v21, %v500_v27 }
 0x24f   : >> { %v478_v56 = vpop.permute.xlu1 %477  ;;  %538 = vrot.lane.b32.xlu1 %v1921_v30, %s1243_s19  ;;  %v476_v26 = vpop.permute.xlu0 %475 }
 0x250   : >> { %v498_v24 = vsel %vm491_vm15, %v476_v26, %v478_v56  ;;  %v499_v6 = vsel %vm491_vm15, %v474_v28, %v476_v26 }
 0x251   : >> { %v1927_v10 = vmax.f32 %v452_v29, %v498_v24 }
 0x253   : >> { %v482_v12 = vpop.permute.xlu1 %481  ;;  %542 = vrot.lane.b32.xlu1 %v1927_v10, %s1243_s19  ;;  %v480_v18 = vpop.permute.xlu0 %479 }
 0x254   : >> { %v496_v55 = vsel %vm491_vm15, %v480_v18, %v482_v12 }
 0x255   : >> { %v1933_v21 = vmax.f32 %v454_v63, %v496_v55 }
 0x257   : >> { %v486_v32 = vpop.permute.xlu1 %485  ;;  %546 = vrot.lane.b32.xlu1 %v1933_v21, %s1243_s19  ;;  %v484_v50 = vpop.permute.xlu0 %483 }
 0x258   : >> { %v494_v53 = vsel %vm491_vm15, %v484_v50, %v486_v32 }
 0x259   : >> { %v1939_v29 = vmax.f32 %v456_v52, %v494_v53  ;;  %v510_v52 = vmax.f32 %v1793_v19, %v505_v33  ;;  %v516_v33 = vmax.f32 %v1844_v59, %v499_v6  ;;  %v497_v19 = vsel %vm491_vm15, %v478_v56, %v480_v18 }
 0x25b   : >> { %v490_v14 = vpop.permute.xlu1 %489  ;;  %550 = vrot.lane.b32.xlu1 %v1939_v29, %s1243_s19  ;;  %v488_v11 = vpop.permute.xlu0 %487 }
 0x25c   : >> { %v507_v27 = vsel %vm491_vm15, %v490_v14, %v460_v31  ;;  %v492_v63 = vsel %vm491_vm15, %v488_v11, %v490_v14  ;;  %v503_v31 = vsel %vm491_vm15, %v466_v9, %v468_v20  ;;  %v495_v9 = vsel %vm491_vm15, %v482_v12, %v484_v50 }
 0x25d   : >> { %v508_v24 = vmax.f32 %v1775_v23, %v507_v27  ;;  %v1948_v55 = vmax.f32 %v458_v8, %v492_v63  ;;  %v512_v53 = vmax.f32 %v1811_v7, %v503_v31  ;;  %v501_v23 = vsel %vm491_vm15, %v470_v5, %v472_v60 }
 0x25e   : >> { %v514_v8 = vmax.f32 %v1829_v22, %v501_v23  ;;  %v518_v7 = vmax.f32 %v1859_v0, %v497_v19  ;;  %v520_v22 = vmax.f32 %v1874_v25, %v495_v9  ;;  %v493_v16 = vsel %vm491_vm15, %v486_v32, %v488_v11 }
 0x25f   : >> { %524 = vrot.lane.b32.xlu0 %v508_v24, %s1243_s19  ;;  %554 = vrot.lane.b32.xlu1 %v1948_v55, %s1243_s19  ;;  %v1980_v59 = vmax.f32 %v1892_v13, %v493_v16 }
 0x263   : >> { %528 = vrot.lane.b32.xlu0 %v510_v52, %s1243_s19 }
 0x267   : >> { %532 = vrot.lane.b32.xlu0 %v512_v53, %s1243_s19 }
 0x26b   : >> { %536 = vrot.lane.b32.xlu0 %v514_v8, %s1243_s19 }
 0x26f   : >> { %540 = vrot.lane.b32.xlu0 %v516_v33, %s1243_s19 }
 0x273   : >> { %544 = vrot.lane.b32.xlu0 %v518_v7, %s1243_s19 }
 0x277   : >> { %548 = vrot.lane.b32.xlu0 %v520_v22, %s1243_s19 }
 0x27b   : >> { %552 = vrot.lane.b32.xlu0 %v1980_v59, %s1243_s19 }
 0x2b5   : >> { %v527_v5 = vpop.permute.xlu1 %526 }
 0x2b9   : >> { %v531_v0 = vpop.permute.xlu1 %530 }
 0x2bd   : >> { %v535_v20 = vpop.permute.xlu1 %534 }
 0x2c1   : >> { %v539_v28 = vpop.permute.xlu1 %538 }
 0x2c5   : >> { %v543_v60 = vpop.permute.xlu1 %542 }
 0x2c9   : >> { %v547_v56 = vpop.permute.xlu1 %546 }
 0x2cd   : >> { %v551_v26 = vpop.permute.xlu1 %550 }
 0x2d1   : >> { %v555_v25 = vpop.permute.xlu1 %554  ;;  %v525_v12 = vpop.permute.xlu0 %524 }
 0x2d2   : >> { %v571_v18 = vsel %vm556_vm0, %v525_v12, %v527_v5  ;;  %v572_v13 = vsel %vm556_vm0, %v555_v25, %v525_v12 }
 0x2d3   : >> { %v1989_v32 = vmax.f32 %v508_v24, %v572_v13  ;;  %v574_v50 = vmax.f32 %v1901_v4, %v571_v18 }
 0x2d5   : >> { %589 = vrot.lane.b32.xlu0 %v1989_v32, %s1244_s20  ;;  %591 = vrot.lane.b32.xlu1 %v574_v50, %s1244_s20  ;;  %v529_v14 = vpop.permute.xlu0 %528 }
 0x2d6   : >> { %v569_v11 = vsel %vm556_vm0, %v529_v14, %v531_v0  ;;  %v570_v27 = vsel %vm556_vm0, %v527_v5, %v529_v14 }
 0x2d7   : >> { %v575_v63 = vmax.f32 %v510_v52, %v570_v27  ;;  %v576_v31 = vmax.f32 %v1908_v17, %v569_v11 }
 0x2d9   : >> { %593 = vrot.lane.b32.xlu0 %v575_v63, %s1244_s20  ;;  %595 = vrot.lane.b32.xlu1 %v576_v31, %s1244_s20  ;;  %v533_v4 = vpop.permute.xlu0 %532 }
 0x2da   : >> { %v567_v24 = vsel %vm556_vm0, %v533_v4, %v535_v20  ;;  %v568_v23 = vsel %vm556_vm0, %v531_v0, %v533_v4 }
 0x2db   : >> { %v2006_v6 = vmax.f32 %v512_v53, %v568_v23  ;;  %v2009_v19 = vmax.f32 %v1915_v15, %v567_v24 }
 0x2dd   : >> { %597 = vrot.lane.b32.xlu0 %v2006_v6, %s1244_s20  ;;  %599 = vrot.lane.b32.xlu1 %v2009_v19, %s1244_s20  ;;  %v537_v17 = vpop.permute.xlu0 %536 }
 0x2de   : >> { %v565_v52 = vsel %vm556_vm0, %v537_v17, %v539_v28  ;;  %v566_v9 = vsel %vm556_vm0, %v535_v20, %v537_v17 }
 0x2df   : >> { %v2019_v16 = vmax.f32 %v514_v8, %v566_v9  ;;  %v2022_v53 = vmax.f32 %v1921_v30, %v565_v52 }
 0x2e1   : >> { %601 = vrot.lane.b32.xlu0 %v2019_v16, %s1244_s20  ;;  %603 = vrot.lane.b32.xlu1 %v2022_v53, %s1244_s20  ;;  %v541_v15 = vpop.permute.xlu0 %540 }
 0x2e2   : >> { %v563_v5 = vsel %vm556_vm0, %v541_v15, %v543_v60  ;;  %v564_v0 = vsel %vm556_vm0, %v539_v28, %v541_v15 }
 0x2e3   : >> { %v2032_v12 = vmax.f32 %v516_v33, %v564_v0  ;;  %v2035_v8 = vmax.f32 %v1927_v10, %v563_v5 }
 0x2e5   : >> { %605 = vrot.lane.b32.xlu0 %v2032_v12, %s1244_s20  ;;  %607 = vrot.lane.b32.xlu1 %v2035_v8, %s1244_s20  ;;  %v545_v30 = vpop.permute.xlu0 %544 }
 0x2e6   : >> { %v561_v20 = vsel %vm556_vm0, %v545_v30, %v547_v56  ;;  %v562_v18 = vsel %vm556_vm0, %v543_v60, %v545_v30 }
 0x2e7   : >> { %v2045_v13 = vmax.f32 %v518_v7, %v562_v18  ;;  %v2048_v33 = vmax.f32 %v1933_v21, %v561_v20 }
 0x2e9   : >> { %609 = vrot.lane.b32.xlu0 %v2045_v13, %s1244_s20  ;;  %611 = vrot.lane.b32.xlu1 %v2048_v33, %s1244_s20  ;;  %v549_v10 = vpop.permute.xlu0 %548 }
 0x2ea   : >> { %v559_v28 = vsel %vm556_vm0, %v549_v10, %v551_v26  ;;  %v560_v14 = vsel %vm556_vm0, %v547_v56, %v549_v10 }
 0x2eb   : >> { %v2058_v11 = vmax.f32 %v520_v22, %v560_v14  ;;  %v2061_v7 = vmax.f32 %v1939_v29, %v559_v28 }
 0x2ed   : >> { %613 = vrot.lane.b32.xlu0 %v2058_v11, %s1244_s20  ;;  %615 = vrot.lane.b32.xlu1 %v2061_v7, %s1244_s20  ;;  %v553_v21 = vpop.permute.xlu0 %552 }
 0x2ee   : >> { %v557_v60 = vsel %vm556_vm0, %v553_v21, %v555_v25  ;;  %v558_v27 = vsel %vm556_vm0, %v551_v26, %v553_v21 }
 0x2ef   : >> { %v2072_v56 = vmax.f32 %v1980_v59, %v558_v27  ;;  %v2075_v22 = vmax.f32 %v1948_v55, %v557_v60 }
 0x2f1   : >> { %617 = vrot.lane.b32.xlu0 %v2072_v56, %s1244_s20  ;;  %619 = vrot.lane.b32.xlu1 %v2075_v22, %s1244_s20 }
 0x347   : >> { %v592_v29 = vpop.permute.xlu1 %591  ;;  %v2082_v4 = vpop.permute.xlu0 %589 }
 0x348   : >> { %v636_v26 = vsel %vm621_vm14, %v2082_v4, %v592_v29 }
 0x349   : >> { %v639_v59 = vmax.f32 %v574_v50, %v636_v26 }
 0x34b   : >> { %v671_v25 = vshra.s32 %v639_v59, 23  ;;  %v596_v24 = vpop.permute.xlu1 %595  ;;  %v594_v55 = vpop.permute.xlu0 %593 }
 0x34c   : >> { %v634_v23 = vsel %vm621_vm14, %v594_v55, %v596_v24  ;;  %v635_v17 = vsel %vm621_vm14, %v592_v29, %v594_v55 }
 0x34d   : >> { %vm688_vm15 = vcmp.gt.s32.totalorder %v671_v25, 3  ;;  %v640_v52 = vmax.f32 %v575_v63, %v635_v17  ;;  %v641_v9 = vmax.f32 %v576_v31, %v634_v23 }
 0x34e   : >> { %v689_v15 = vsel %vm688_vm15, %v671_v25, 3 }
 0x34f   : >> { %v1015_v5 = vadd.s32 4294967294, %v689_v15  ;;  %v767_v0 = vsub.s32 256, %v689_v15  ;;  %v672_v30 = vshra.s32 %v640_v52, 23  ;;  %v673_v20 = vshra.s32 %v641_v9, 23  ;;  %v600_v18 = vpop.permute.xlu1 %599  ;;  %v598_v10 = vpop.permute.xlu0 %597 }
 0x350   : >> { %v632_v50 = vsel %vm621_vm14, %v598_v10, %v600_v18  ;;  %v633_v28 = vsel %vm621_vm14, %v596_v24, %v598_v10 }
 0x351   : >> { %v783_v14 = vshll.u32 %v767_v0, 23  ;;  %vm690_vm0 = vcmp.gt.s32.totalorder %v672_v30, 3  ;;  %vm692_vm1 = vcmp.gt.s32.totalorder %v673_v20, 3  ;;  %v642_v63 = vmax.f32 %v2006_v6, %v633_v28 }
 0x352   : >> { %v691_v21 = vsel %vm690_vm0, %v672_v30, 3  ;;  %v693_v60 = vsel %vm692_vm1, %v673_v20, 3  ;;  %v643_v31 = vmax.f32 %v2009_v19, %v632_v50  ;;  %v735_v27 = vshll.u32 %v1015_v5, 23 }
 0x353   : >> { %v815_v29 = vmul.f32 %v783_v14, %v1477_v54  ;;  %v1016_v26 = vadd.s32 4294967294, %v691_v21  ;;  %v768_v59 = vsub.s32 256, %v691_v21  ;;  %v604_v25 = vpop.permute.xlu1 %603  ;;  %v602_v55 = vpop.permute.xlu0 %601  ;;  %v1017_v23 = vadd.s32 4294967294, %v693_v60 }
 0x354   : >> { %v769_v24 = vsub.s32 256, %v693_v60  ;;  %v674_v17 = vshra.s32 %v642_v63, 23  ;;  %v675_v52 = vshra.s32 %v643_v31, 23  ;;  %v630_v6 = vsel %vm621_vm14, %v602_v55, %v604_v25 }
 0x355   : >> { %v1053_v9 = vround.rtne.f32 %v815_v29  ;;  %v736_v15 = vshll.u32 %v1016_v26, 23  ;;  %v784_v0 = vshll.u32 %v768_v59, 23  ;;  %v631_v54 = vsel %vm621_vm14, %v600_v18, %v602_v55 }
 0x356   : >> { %v785_v19 = vshll.u32 %v769_v24, 23  ;;  %vm694_vm1 = vcmp.gt.s32.totalorder %v674_v17, 3  ;;  %vm696_vm15 = vcmp.gt.s32.totalorder %v675_v52, 3  ;;  %v737_v50 = vshll.u32 %v1017_v23, 23 }
 0x357   : >> { %v847_v5 = vmin.f32 %v1053_v9, 7.0  ;;  %v816_v30 = vmul.f32 %v784_v0, %v1469_v49  ;;  %v695_v20 = vsel %vm694_vm1, %v674_v17, 3  ;;  %v697_v10 = vsel %vm696_vm15, %v675_v52, 3  ;;  %v608_v18 = vpop.permute.xlu1 %607  ;;  %v606_v26 = vpop.permute.xlu0 %605 }
 0x358   : >> { %v817_v28 = vmul.f32 %v785_v19, %v1473_v51  ;;  %v1018_v14 = vadd.s32 4294967294, %v695_v20  ;;  %v770_v21 = vsub.s32 256, %v695_v20  ;;  %v771_v31 = vsub.s32 256, %v697_v10 }
 0x359   : >> { %v863_v60 = vmul.f32 %v847_v5, %v735_v27  ;;  %v1054_v63 = vround.rtne.f32 %v816_v30  ;;  %v644_v29 = vmax.f32 %v2019_v16, %v631_v54  ;;  %v1019_v49 = vadd.s32 4294967294, %v697_v10 }
 0x35a   : >> { %v1055_v59 = vround.rtne.f32 %v817_v28  ;;  %v738_v55 = vshll.u32 %v1018_v14, 23  ;;  %v786_v24 = vshll.u32 %v770_v21, 23  ;;  %v787_v52 = vshll.u32 %v771_v31, 23 }
 0x35b   : >> { %881 = vst [vmem:[%s2106_s21 + $0x8] sm:$0xff] %v863_v60  ;;  %v848_v17 = vmin.f32 %v1054_v63, 7.0  ;;  %v645_v23 = vmax.f32 %v2022_v53, %v630_v6  ;;  %v676_v51 = vshra.s32 %v644_v29, 23  ;;  %v628_v0 = vsel %vm621_vm14, %v606_v26, %v608_v18  ;;  %v612_v14 = vpop.permute.xlu1 %611  ;;  %v610_v21 = vpop.permute.xlu0 %609 }
 0x35c   : >> { %v849_v9 = vmin.f32 %v1055_v59, 7.0  ;;  %v818_v27 = vmul.f32 %v786_v24, %v1489_v58  ;;  %v629_v16 = vsel %vm621_vm14, %v604_v25, %v606_v26  ;;  %v819_v54 = vmul.f32 %v787_v52, %v1486_v57 }
 0x35d   : >> { %v864_v19 = vmul.f32 %v848_v17, %v736_v15  ;;  %v677_v5 = vshra.s32 %v645_v23, 23  ;;  %vm698_vm0 = vcmp.gt.s32.totalorder %v676_v51, 3  ;;  %v646_v53 = vmax.f32 %v2032_v12, %v629_v16 }
 0x35e   : >> { %v865_v30 = vmul.f32 %v849_v9, %v737_v50  ;;  %v1056_v20 = vround.rtne.f32 %v818_v27  ;;  %v699_v10 = vsel %vm698_vm0, %v676_v51, 3  ;;  %v1057_v6 = vround.rtne.f32 %v819_v54 }
 0x35f   : >> { %882 = vst [vmem:[%s2106_s21 + $0x10] sm:$0xff] %v864_v19  ;;  %vm700_vm1 = vcmp.gt.s32.totalorder %v677_v5, 3  ;;  %v1020_v58 = vadd.s32 4294967294, %v699_v10  ;;  %v772_v28 = vsub.s32 256, %v699_v10  ;;  %v647_v57 = vmax.f32 %v2035_v8, %v628_v0  ;;  %v2130_v16 = vpop.permute.xlu1 %615  ;;  %v614_v19 = vpop.permute.xlu0 %613 }
 0x360   : >> { %883 = vst [vmem:[%s2106_s21 + $0x18] sm:$0xff] %v865_v30  ;;  %v850_v25 = vmin.f32 %v1056_v20, 7.0  ;;  %v701_v15 = vsel %vm700_vm1, %v677_v5, 3  ;;  %v678_v60 = vshra.s32 %v646_v53, 23  ;;  %v739_v63 = vshll.u32 %v1019_v49, 23 }
 0x361   : >> { %v851_v50 = vmin.f32 %v1057_v6, 7.0  ;;  %v1021_v31 = vadd.s32 4294967294, %v701_v15  ;;  %v773_v29 = vsub.s32 256, %v701_v15  ;;  %v788_v26 = vshll.u32 %v772_v28, 23 }
 0x362   : >> { %v866_v12 = vmul.f32 %v850_v25, %v738_v55  ;;  %v679_v59 = vshra.s32 %v647_v57, 23  ;;  %vm702_vm15 = vcmp.gt.s32.totalorder %v678_v60, 3  ;;  %v740_v17 = vshll.u32 %v1020_v58, 23 }
 0x363   : >> { %v867_v24 = vmul.f32 %v851_v50, %v739_v63  ;;  %v789_v52 = vshll.u32 %v773_v29, 23  ;;  %v703_v23 = vsel %vm702_vm15, %v678_v60, 3  ;;  %v820_v51 = vmul.f32 %v788_v26, %v1499_v62 }
 0x364   : >> { %884 = vst [vmem:[%s2106_s21 + $0x20] sm:$0xff] %v866_v12  ;;  %vm704_vm0 = vcmp.gt.s32.totalorder %v679_v59, 3  ;;  %v1022_v9 = vadd.s32 4294967294, %v703_v23  ;;  %v774_v8 = vsub.s32 256, %v703_v23  ;;  %v626_v55 = vsel %vm621_vm14, %v610_v21, %v612_v14 }
 0x365   : >> { %885 = vst [vmem:[%s2106_s21 + $0x28] sm:$0xff] %v867_v24  ;;  %v821_v49 = vmul.f32 %v789_v52, %v1496_v61  ;;  %v705_v27 = vsel %vm704_vm0, %v679_v59, 3  ;;  %v627_v0 = vsel %vm621_vm14, %v608_v18, %v610_v21  ;;  %v741_v54 = vshll.u32 %v1021_v31, 23 }
 0x366   : >> { %v1058_v5 = vround.rtne.f32 %v820_v51  ;;  %v1023_v30 = vadd.s32 4294967294, %v705_v27  ;;  %v775_v62 = vsub.s32 256, %v705_v27  ;;  %v790_v10 = vshll.u32 %v774_v8, 23  ;;  %v620_v51 = vpop.permute.xlu1 %619 }
 0x367   : >> { %v1059_v20 = vround.rtne.f32 %v821_v49  ;;  %v648_v53 = vmax.f32 %v2045_v13, %v627_v0  ;;  %v649_v61 = vmax.f32 %v2048_v33, %v626_v55  ;;  %v742_v58 = vshll.u32 %v1022_v9, 23  ;;  %v1125_v0 = vld [vmem:[%s1466_s4 + $0x50] sm:$0xff] }
 0x368   : >> { %v852_v6 = vmin.f32 %v1058_v5, 7.0  ;;  %v791_v28 = vshll.u32 %v775_v62, 23  ;;  %v624_v18 = vsel %vm621_vm14, %v614_v19, %v2130_v16  ;;  %v822_v25 = vmul.f32 %v790_v10, %v1509_v3 }
 0x369   : >> { %v853_v21 = vmin.f32 %v1059_v20, 7.0  ;;  %v680_v15 = vshra.s32 %v648_v53, 23  ;;  %v681_v57 = vshra.s32 %v649_v61, 23  ;;  %v625_v13 = vsel %vm621_vm14, %v612_v14, %v614_v19  ;;  %v1126_v20 = vld [vmem:[%s1466_s4 + $0x58] sm:$0xff] }
 0x36a   : >> { %v868_v60 = vmul.f32 %v852_v6, %v740_v17  ;;  %v823_v63 = vmul.f32 %v791_v28, %v1506_v2  ;;  %v651_v33 = vmax.f32 %v2061_v7, %v624_v18  ;;  %v1060_v31 = vround.rtne.f32 %v822_v25 }
 0x36b   : >> { %v869_v50 = vmul.f32 %v853_v21, %v741_v54  ;;  %vm706_vm1 = vcmp.gt.s32.totalorder %v680_v15, 3  ;;  %vm708_vm15 = vcmp.gt.s32.totalorder %v681_v57, 3  ;;  %v650_v3 = vmax.f32 %v2058_v11, %v625_v13  ;;  %v618_v11 = vpop.permute.xlu0 %617 }
 0x36c   : >> { %886 = vst [vmem:[%s2106_s21 + $0x30] sm:$0xff] %v868_v60  ;;  %v1061_v29 = vround.rtne.f32 %v823_v63  ;;  %v707_v12 = vsel %vm706_vm1, %v680_v15, 3  ;;  %v709_v26 = vsel %vm708_vm15, %v681_v57, 3  ;;  %v743_v59 = vshll.u32 %v1023_v30, 23 }
 0x36d   : >> { %887 = vst [vmem:[%s2106_s21 + $0x38] sm:$0xff] %v869_v50  ;;  %v854_v24 = vmin.f32 %v1060_v31, 7.0  ;;  %v1024_v2 = vadd.s32 4294967294, %v707_v12  ;;  %v776_v17 = vsub.s32 256, %v707_v12  ;;  %v777_v52 = vsub.s32 256, %v709_v26 }
 0x36e   : >> { %v855_v14 = vmin.f32 %v1061_v29, 7.0  ;;  %v682_v7 = vshra.s32 %v650_v3, 23  ;;  %v683_v23 = vshra.s32 %v651_v33, 23  ;;  %v1025_v8 = vadd.s32 4294967294, %v709_v26  ;;  %v1127_v33 = vld [vmem:[%s1466_s4 + $0x60] sm:$0xff]  ;;  %v1128_v26 = vld [vmem:[%s1466_s4 + $0x68] sm:$0xff] }
 0x36f   : >> { %v870_v9 = vmul.f32 %v854_v24, %v742_v58  ;;  %v792_v49 = vshll.u32 %v776_v17, 23  ;;  %v793_v55 = vshll.u32 %v777_v52, 23  ;;  %v637_v30 = vsel %vm621_vm14, %v620_v51, %v2082_v4 }
 0x370   : >> { %v871_v27 = vmul.f32 %v855_v14, %v743_v59  ;;  %vm710_vm0 = vcmp.gt.s32.totalorder %v682_v7, 3  ;;  %vm712_vm1 = vcmp.gt.s32.totalorder %v683_v23, 3  ;;  %v744_v62 = vshll.u32 %v1024_v2, 23 }
 0x371   : >> { %888 = vst [vmem:[%s2106_s21 + $0x40] sm:$0xff] %v870_v9  ;;  %v824_v19 = vmul.f32 %v1125_v0, %v792_v49  ;;  %v711_v54 = vsel %vm710_vm0, %v682_v7, 3  ;;  %v713_v5 = vsel %vm712_vm1, %v683_v23, 3  ;;  %v825_v10 = vmul.f32 %v1126_v20, %v793_v55 }
 0x372   : >> { %889 = vst [vmem:[%s2106_s21 + $0x48] sm:$0xff] %v871_v27  ;;  %v778_v53 = vsub.s32 256, %v711_v54  ;;  %v779_v6 = vsub.s32 256, %v713_v5  ;;  %v638_v58 = vmax.f32 %v1989_v32, %v637_v30  ;;  %v622_v28 = vsel %vm621_vm14, %v618_v11, %v620_v51 }
 0x373   : >> { %v1062_v61 = vround.rtne.f32 %v824_v19  ;;  %v745_v18 = vshll.u32 %v1025_v8, 23  ;;  %v1063_v21 = vround.rtne.f32 %v825_v10  ;;  %v1026_v25 = vadd.s32 4294967294, %v711_v54  ;;  %v1130_v10 = vld [vmem:[%s1466_s4 + $0x70] sm:$0xff] }
 0x374   : >> { %v794_v15 = vshll.u32 %v778_v53, 23  ;;  %v795_v4 = vshll.u32 %v779_v6, 23  ;;  %v670_v60 = vshra.s32 %v638_v58, 23  ;;  %v623_v63 = vsel %vm621_vm14, %v2130_v16, %v618_v11  ;;  %v1129_v11 = vld [vmem:[%s1466_s4] sm:$0xff] }
 0x375   : >> { %v856_v57 = vmin.f32 %v1062_v61, 7.0  ;;  %v857_v13 = vmin.f32 %v1063_v21, 7.0  ;;  %v652_v32 = vmax.f32 %v2072_v56, %v623_v63  ;;  %v653_v31 = vmax.f32 %v2075_v22, %v622_v28  ;;  %v1131_v28 = vld [vmem:[%s1466_s4 + $0x78] sm:$0xff] }
 0x376   : >> { %v826_v50 = vmul.f32 %v1127_v33, %v794_v15  ;;  %v1027_v12 = vadd.s32 4294967294, %v713_v5  ;;  %v827_v3 = vmul.f32 %v1128_v26, %v795_v4  ;;  %vm686_vm15 = vcmp.gt.s32.totalorder %v670_v60, 3 }
 0x377   : >> { %v872_v29 = vmul.f32 %v856_v57, %v744_v62  ;;  %v873_v59 = vmul.f32 %v857_v13, %v745_v18  ;;  %v687_v2 = vsel %vm686_vm15, %v670_v60, 3  ;;  %v684_v17 = vshra.s32 %v652_v32, 23 }
 0x378   : >> { %v1064_v24 = vround.rtne.f32 %v826_v50  ;;  %v1065_v14 = vround.rtne.f32 %v827_v3  ;;  %v766_v16 = vsub.s32 256, %v687_v2  ;;  %v685_v52 = vshra.s32 %v653_v31, 23 }
 0x379   : >> { %890 = vst [vmem:[%s2106_s21 + $0x50] sm:$0xff] %v872_v29  ;;  %891 = vst [vmem:[%s2106_s21 + $0x58] sm:$0xff] %v873_v59  ;;  %v746_v7 = vshll.u32 %v1026_v25, 23  ;;  %vm714_vm14 = vcmp.gt.s32.totalorder %v684_v17, 3  ;;  %v747_v22 = vshll.u32 %v1027_v12, 23  ;;  %v1014_v55 = vadd.s32 4294967294, %v687_v2 }
 0x37a   : >> { %v858_v56 = vmin.f32 %v1064_v24, 7.0  ;;  %v859_v23 = vmin.f32 %v1065_v14, 7.0  ;;  %v782_v51 = vshll.u32 %v766_v16, 23  ;;  %v715_v9 = vsel %vm714_vm14, %v684_v17, 3 }
 0x37b   : >> { %vm716_vm0 = vcmp.gt.s32.totalorder %v685_v52, 3  ;;  %v780_v49 = vsub.s32 256, %v715_v9  ;;  %v1028_v62 = vadd.s32 4294967294, %v715_v9  ;;  %v734_v61 = vshll.u32 %v1014_v55, 23 }
 0x37c   : >> { %v874_v8 = vmul.f32 %v858_v56, %v746_v7  ;;  %v875_v27 = vmul.f32 %v859_v23, %v747_v22  ;;  %v814_v0 = vmul.f32 %v1129_v11, %v782_v51  ;;  %v717_v19 = vsel %vm716_vm0, %v685_v52, 3 }
 0x37d   : >> { %v781_v54 = vsub.s32 256, %v717_v19  ;;  %v796_v5 = vshll.u32 %v780_v49, 23  ;;  %v1029_v58 = vadd.s32 4294967294, %v717_v19  ;;  %v748_v15 = vshll.u32 %v1028_v62, 23 }
 0x37e   : >> { %892 = vst [vmem:[%s2106_s21 + $0x60] sm:$0xff] %v874_v8  ;;  %893 = vst [vmem:[%s2106_s21 + $0x68] sm:$0xff] %v875_v27  ;;  %v1052_v30 = vround.rtne.f32 %v814_v0 }
 0x37f   : >> { %v797_v20 = vshll.u32 %v781_v54, 23  ;;  %v828_v53 = vmul.f32 %v1130_v10, %v796_v5  ;;  %v749_v60 = vshll.u32 %v1029_v58, 23 }
 0x380   : >> { %v846_v6 = vmin.f32 %v1052_v30, 7.0 }
 0x381   : >> { %v829_v18 = vmul.f32 %v1131_v28, %v797_v20  ;;  %v1066_v21 = vround.rtne.f32 %v828_v53 }
 0x382   : >> { %v862_v25 = vmul.f32 %v846_v6, %v734_v61 }
 0x383   : >> { %v1067_v57 = vround.rtne.f32 %v829_v18  ;;  %v860_v4 = vmin.f32 %v1066_v21, 7.0  ;;  %208 = sbr.rel (!%p206_p6) target bundleno = 91 (0x5b), region = 78 }
 0x384   : >> { %880 = vst [vmem:[%s2106_s21] sm:$0xff] %v862_v25 }
 0x385   : >> { %v861_v63 = vmin.f32 %v1067_v57, 7.0  ;;  %v876_v13 = vmul.f32 %v860_v4, %v748_v15 }
 0x387   : >> { %v877_v33 = vmul.f32 %v861_v63, %v749_v60  ;;  %894 = vst [vmem:[%s2106_s21 + $0x70] sm:$0xff] %v876_v13 }
 0x389   : >> { %895 = vst [vmem:[%s2106_s21 + $0x78] sm:$0xff] %v877_v33 }
 0x38a   : > { %903 = sbr.rel (!%p1302_p9) target bundleno = 941 (0x3ad), region = 39 }
 0x38b   : > { %s904_s24 = smul.u32 (%p1302_p9), 3, %s1279_s10 }
 0x38d   : > { %s905_s26 = ssub.s32 (%p1302_p9), 25, %s904_s24 }
 0x38e   : > { %p906_p10 = scmp.lt.s32.totalorder (%p1302_p9), %s905_s26, 3 }
 0x391   : > { %s2289_s26 = smov (!%p906_p10, %s905_s26), 3 }
 0x392   : > { %s2179_s29 = sshll.u32 %s2289_s26, 11 }
 0x393   : > { %s911_s30 = ssub.s32 6144, %s2179_s29 }
 0x394   : > { %912 = vsyncadd %s897_s22, %s911_s30  ;;  %p1033_p13 = scmp.ne.s32.totalorder %s2179_s29, 0  ;;  %s1049_s17 = smul.u32 6144, %s1279_s10 }
 0x395   : > { %s918_s3 = sshll.u32 %s1452_s16, 4  ;;  %s1245_s4 = smov [#allocation5]   ;;  %s2192_s3 = int_to_ptr.vmem [resolvable:$true] %s918_s3 }
 0x396   : > { %s2190_s28 = scalar_lea.hbm %s2238_s1, %s1049_s17  ;;  %s1160_s2 = scalar_lea.vmem %s2192_s3, %s2179_s29 }
 0x397   : > { %p1161_p9 = scmp.ne.s32.totalorder %s2192_s3, %s1160_s2  ;;  %s1164_s5 = sshll.u32 %s1245_s4, 4  ;;  %s1165_s5 = int_to_ptr.vmem [resolvable:$false] %s1164_s5 }
 0x398   : > { %s1166_s10 = scalar_lea.vmem %s1165_s5, 12288  ;;  %p1167_p0 = scmp.lt.s32.totalorder %s2192_s3, %s1165_s5 }
 0x399   : > { %p1162_p11 = pnand %p1161_p9, %p1033_p13  ;;  %p1168_p1 = scmp.lt.s32.totalorder %s1166_s10, %s1160_s2 }
 0x39b   : > { %p1163_p12 = pneg %p1162_p11  ;;  %p1169_p3 = por %p1168_p1, %p1167_p0 }
 0x39d   : > { %p1170_p4 = pnand %p1169_p3, %p1163_p12 }
 0x39f   : > { %1173 = shalt.err (!%p1170_p4)
}
 0x3a0   : > { %s1174_s16 = scalar_lea.hbm %s2190_s28, %s2179_s29  ;;  %s1178_s14 = scalar_lea.hbm %s2238_s1, 51200 }
 0x3a1   : > { %p1175_p5 = scmp.ne.s32.totalorder %s2190_s28, %s1174_s16  ;;  %p1179_p8 = scmp.lt.u32.totalorder %s2190_s28, %s2238_s1 }
 0x3a2   : > { %p1180_p6 = scmp.lt.u32.totalorder %s1178_s14, %s1174_s16  ;;  %p1182_p9 = scmp.lt.u32.totalorder %s1174_s16, %s2190_s28 }
 0x3a3   : > { %p1176_p2 = pnand %p1175_p5, %p1033_p13 }
 0x3a4   : > { %p1181_p10 = por %p1180_p6, %p1179_p8 }
 0x3a5   : > { %p1177_p7 = pneg %p1176_p2 }
 0x3a6   : > { %p1183_p11 = por %p1182_p9, %p1181_p10 }
 0x3a8   : > { %p1184_p12 = pnand %p1183_p11, %p1177_p7 }
 0x3aa   : > { %1187 = shalt.err (!%p1184_p12)
}
 0x3ab   : > { %s1246_s21 = smov 2048   ;;  %s1247_s24 = smov 128  }
 0x3ac   : > { %924 = dma.vmem_to_hbm [thread:$0]  (%p1033_p13), %s2192_s3, %s2179_s29, %s2190_s28, %s897_s22, %s1246_s21, %s1246_s21, %s1247_s24  }
 0x3ad PF: > { %p1074_p0 = scmp.ge.s32.totalorder %s1230_s9, 2  ;;  %s933_s26 = sand.u32 1, %s1218_s6  }
 0x3ae   : > { %p2281_p1 = scmp.ne.s32.totalorder %s2242_s18, 0  ;;  %s934_s30 = scalar_lea.sflag [#allocation4], %s933_s26 }
 0x3b0   : > { %p1071_p3 = pnand %p1074_p0, %p2281_p1 }
 0x3b2   : > { %1213 = dma.done.wait (!%p1071_p3), %s934_s30, 6144  }
 0x3b3   : > { %1215 = vsyncadd (!%p1071_p3), %s934_s30, 4294961152  ;;  %p14_p4 = scmp.ge.s32.totalorder %s1283_s12, 11   ;;  %s2282_s6 = smov %s1222_s7 }
 0x3b4   : > { %s2283_s7 = smov %s1226_s8  ;;  %s2284_s8 = smov %s1295_s15 }
 0x3b5   : > { %s2285_s9 = smov %s1283_s12  ;;  %16 = sbr.rel (!%p14_p4) target bundleno = 5 (0x5), region = 89 }
 0x3bc   :  { %939 = vsyncpa [#allocation3], 1 }
 0x3bd   :  { %941 = vsyncpa [#allocation3 + $0x1], 1 }
 0x3be   :  { %942 = vsyncpa [#allocation4], 1 }
 0x3bf   :  { %944 = vsyncpa [#allocation4 + $0x1], 1 }

</bundles_post_ra>
